<compile_context>
chip_gen: v6e
topology: v6e:2x2x1
jax: 0.10.0
libtpu: 0.0.40
codegen_flags: <defaults>
</compile_context>

<pallas_src>
import functools

import jax
import jax.numpy as jnp
from jax.experimental import pallas as pl
from jax.experimental.pallas import tpu as pltpu


# ---------------------------------------------------------------------------
# Fused attention kernel: one grid step == one batch element, all heads.
# ---------------------------------------------------------------------------
def _fused_attn_kernel(x_ref, wq_ref, wk_ref, wv_ref, wo_ref, bo_ref, o_ref,
                       *, heads, scale, compute_dtype):
    x = x_ref[0]                                  # (N, dim), input dtype
    N, dim = x.shape

    x_kv = x.astype(compute_dtype)                # used for K / V projections
    x_q = (x * scale).astype(compute_dtype)       # scale folded into q input

    # f32 accumulator for the (already folded-in) output projection.
    y = jnp.zeros((N, dim), jnp.float32)

    # heads is small & static -> trace-time unrolled loop of 2-D matmuls.
    for h in range(heads):
        wq_h = wq_ref[h].astype(compute_dtype)    # (dim, dh)
        wk_h = wk_ref[h].astype(compute_dtype)    # (dim, dh)
        wv_h = wv_ref[h].astype(compute_dtype)    # (dim, dh)

        q_h = jnp.dot(x_q, wq_h, preferred_element_type=jnp.float32)   # (N, dh)
        k_h = jnp.dot(x_kv, wk_h, preferred_element_type=jnp.float32)  # (N, dh)
        v_h = jnp.dot(x_kv, wv_h, preferred_element_type=jnp.float32)  # (N, dh)

        # scores = q k^T : contract last axes directly (no in-kernel k.T).
        s = jax.lax.dot_general(
            q_h.astype(compute_dtype), k_h.astype(compute_dtype),
            dimension_numbers=(((1,), (1,)), ((), ())),
            preferred_element_type=jnp.float32)                        # (N, N)

        # numerically-stable softmax (f32 VPU/EUP math on every generation).
        s = s - jnp.max(s, axis=-1, keepdims=True)
        p = jnp.exp(s)
        p = p * pl.reciprocal(jnp.sum(p, axis=-1, keepdims=True), approx=True)

        o_h = jnp.dot(p.astype(compute_dtype), v_h.astype(compute_dtype),
                      preferred_element_type=jnp.float32)              # (N, dh)

        # Output projection folded per head:  y += o_h @ Wo[h]
        # (equivalent to concat over heads followed by one big matmul,
        #  but avoids any in-kernel concatenate / reshape).
        wo_h = wo_ref[h].astype(compute_dtype)    # (dh, dim)
        y = y + jnp.dot(o_h.astype(compute_dtype), wo_h,
                        preferred_element_type=jnp.float32)

    o_ref[0] = (y + bo_ref[...]).astype(o_ref.dtype)


# ---------------------------------------------------------------------------
# One-time parameter preparation (PyTorch Linear layout -> per-head layout).
# Done ONCE at init so no per-forward weight transposes are needed.
# ---------------------------------------------------------------------------
def prepare_params(torch_params, heads, dim_head):
    w_qkv = torch_params["w_qkv"]    # (3*inner, dim)   PyTorch Linear (out, in)
    w_out = torch_params["w_out"]    # (dim, inner)
    b_out = torch_params["b_out"]    # (dim,)
    inner = heads * dim_head
    dim = w_qkv.shape[1]

    def to_heads(w):                 # (inner, dim) -> (H, dim, dh)
        return jnp.transpose(w.reshape(heads, dim_head, dim), (0, 2, 1))

    return {
        "wq_heads": to_heads(w_qkv[0 * inner:1 * inner]),
        "wk_heads": to_heads(w_qkv[1 * inner:2 * inner]),
        "wv_heads": to_heads(w_qkv[2 * inner:3 * inner]),
        # (inner, dim) -> (H, dh, dim) ; wo_heads[h] = w_out[:, h*dh:(h+1)*dh].T
        "wo_heads": jnp.transpose(w_out, (1, 0)).reshape(heads, dim_head, dim),
        "b_out": b_out,
    }


# ---------------------------------------------------------------------------
# Full module forward (mirrors the PyTorch Attention.forward)
# ---------------------------------------------------------------------------
def attention_forward(x, params, heads, dim_head, compute_dtype=jnp.float32):
    B, N, dim = x.shape
    inner = heads * dim_head
    scale = dim_head ** (-0.5)

    wq = params["wq_heads"]          # (H, dim, dh)
    wk = params["wk_heads"]          # (H, dim, dh)
    wv = params["wv_heads"]          # (H, dim, dh)
    wo = params["wo_heads"]          # (H, dh, dim)
    bo = params["b_out"].reshape(1, dim)

    kern = functools.partial(_fused_attn_kernel, heads=heads, scale=scale,
                             compute_dtype=compute_dtype)

    # Advisory cost estimate for XLA scheduling around the custom call.
    flops = B * (8 * N * dim * inner + 4 * N * N * inner)
    bytes_accessed = (x.size + wq.size + wk.size + wv.size + wo.size
                      + bo.size + B * N * dim) * x.dtype.itemsize
    cost = pl.CostEstimate(flops=flops,
                           transcendentals=B * heads * N * N,
                           bytes_accessed=bytes_accessed)

    w_head_spec = pl.BlockSpec((heads, dim, dim_head), lambda b: (0, 0, 0))
    wo_spec = pl.BlockSpec((heads, dim_head, dim), lambda b: (0, 0, 0))

    return pl.pallas_call(
        kern,
        out_shape=jax.ShapeDtypeStruct((B, N, dim), x.dtype),
        grid=(B,),
        in_specs=[
            pl.BlockSpec((1, N, dim), lambda b: (b, 0, 0)),   # x (per batch)
            w_head_spec, w_head_spec, w_head_spec,            # Wq, Wk, Wv
            wo_spec,                                          # Wo
            pl.BlockSpec((1, dim), lambda b: (0, 0)),         # bias
        ],
        out_specs=pl.BlockSpec((1, N, dim), lambda b: (b, 0, 0)),
        compiler_params=pltpu.CompilerParams(
            dimension_semantics=("parallel",),                # megacore on v7x
            vmem_limit_bytes=48 * 1024 * 1024,                # headroom < 64 MiB
        ),
        cost_estimate=cost,
    )(x, wq, wk, wv, wo, bo)


# ---------------------------------------------------------------------------
# Pure-JAX reference (PyTorch-layout params) for sanity checking
# ---------------------------------------------------------------------------
def attention_reference(x, torch_params, heads, dim_head):
    B, N, dim = x.shape
    inner = heads * dim_head
    scale = dim_head ** (-0.5)
    qkv = x @ torch_params["w_qkv"].T
    q, k, v = jnp.split(qkv, 3, axis=-1)

    def to_heads(t):
        return jnp.transpose(t.reshape(B, N, heads, dim_head), (0, 2, 1, 3))

    q, k, v = map(to_heads, (q, k, v))
    dots = jnp.einsum("bhnd,bhmd->bhnm", q, k) * scale
    attn = jax.nn.softmax(dots, axis=-1)
    out = jnp.einsum("bhnm,bhmd->bhnd", attn, v)
    out = jnp.transpose(out, (0, 2, 1, 3)).reshape(B, N, inner)
    return out @ torch_params["w_out"].T + torch_params["b_out"]


if __name__ == "__main__":
    # Small shapes consistent with the module: dim=32, heads=4, dim_head=16.
    B, N, dim = 2, 8, 32
    heads, dim_head = 4, 16
    inner = heads * dim_head

    key = jax.random.PRNGKey(0)
    k_x, k_qkv, k_w, k_b = jax.random.split(key, 4)

    x = jax.random.normal(k_x, (B, N, dim), dtype=jnp.float32)
    torch_params = {
        # PyTorch Linear layout: (out_features, in_features)
        "w_qkv": jax.random.normal(k_qkv, (3 * inner, dim), jnp.float32) * 0.05,
        "w_out": jax.random.normal(k_w, (dim, inner), jnp.float32) * 0.05,
        "b_out": jax.random.normal(k_b, (dim,), jnp.float32) * 0.05,
    }
    params = prepare_params(torch_params, heads, dim_head)   # one-time prep

    y_ref = attention_reference(x, torch_params, heads, dim_head)

    # f32 path (tight tolerance; approx reciprocal only adds ~2e-4 rel error).
    y32 = jax.block_until_ready(
        attention_forward(x, params, heads, dim_head, compute_dtype=jnp.float32))
    assert y32.shape == (B, N, dim)
    assert jnp.allclose(y32, y_ref, atol=2e-3, rtol=2e-3), "f32 mismatch vs reference"

    # bf16 MXU path (recommended on v6e/v7x; f32 accumulation + f32 softmax).
    y16 = jax.block_until_ready(
        attention_forward(x, params, heads, dim_head, compute_dtype=jnp.bfloat16))
    assert jnp.allclose(y16, y_ref, atol=3e-2, rtol=3e-2), "bf16 mismatch vs reference"

    print("KERNEL_OK")
</pallas_src>

<mosaic_0001>
module attributes {stable_mosaic.version = 11 : i64} {
  func.func @_fused_attn_kernel(%arg0: i32, %arg1: memref<1x8x32xf32, #tpu.memory_space<vmem>>, %arg2: memref<4x32x16xf32, #tpu.memory_space<vmem>>, %arg3: memref<4x32x16xf32, #tpu.memory_space<vmem>>, %arg4: memref<4x32x16xf32, #tpu.memory_space<vmem>>, %arg5: memref<4x16x32xf32, #tpu.memory_space<vmem>>, %arg6: memref<1x32xf32, #tpu.memory_space<vmem>>, %arg7: memref<1x8x32xf32, #tpu.memory_space<vmem>>) attributes {dimension_semantics = [#tpu.dimension_semantics<parallel>], iteration_bounds = array<i64: 2>, scalar_prefetch = 0 : i64, scratch_operands = 0 : i64, tpu.core_type = #tpu.core_type<tc>, window_params = [{transform_indices = @transform_0, window_bounds = array<i64: 1, 8, 32>}, {pipeline_mode = #tpu.pipeline_mode<synchronous>, transform_indices = @transform_1, window_bounds = array<i64: 4, 32, 16>}, {pipeline_mode = #tpu.pipeline_mode<synchronous>, transform_indices = @transform_2, window_bounds = array<i64: 4, 32, 16>}, {pipeline_mode = #tpu.pipeline_mode<synchronous>, transform_indices = @transform_3, window_bounds = array<i64: 4, 32, 16>}, {pipeline_mode = #tpu.pipeline_mode<synchronous>, transform_indices = @transform_4, window_bounds = array<i64: 4, 16, 32>}, {pipeline_mode = #tpu.pipeline_mode<synchronous>, transform_indices = @transform_5, window_bounds = array<i64: 1, 32>}, {transform_indices = @transform_6, window_bounds = array<i64: 1, 8, 32>}]} {
    %c0 = arith.constant 0 : index
    %c0_0 = arith.constant 0 : index
    %c0_1 = arith.constant 0 : index
    %0 = vector.load %arg1[%c0, %c0_0, %c0_1] : memref<1x8x32xf32, #tpu.memory_space<vmem>>, vector<1x8x32xf32>
    %1 = vector.shape_cast %0 : vector<1x8x32xf32> to vector<8x32xf32>
    %cst = arith.constant 2.500000e-01 : f32
    %2 = vector.broadcast %cst : f32 to vector<8x32xf32>
    %3 = arith.mulf %1, %2 : vector<8x32xf32>
    %cst_2 = arith.constant 0.000000e+00 : f32
    %4 = vector.broadcast %cst_2 : f32 to vector<8x32xf32>
    %c0_3 = arith.constant 0 : index
    %c0_4 = arith.constant 0 : index
    %c0_5 = arith.constant 0 : index
    %5 = vector.load %arg2[%c0_3, %c0_4, %c0_5] : memref<4x32x16xf32, #tpu.memory_space<vmem>>, vector<1x32x16xf32>
    %6 = vector.shape_cast %5 : vector<1x32x16xf32> to vector<32x16xf32>
    %c0_6 = arith.constant 0 : index
    %c0_7 = arith.constant 0 : index
    %c0_8 = arith.constant 0 : index
    %7 = vector.load %arg3[%c0_6, %c0_7, %c0_8] : memref<4x32x16xf32, #tpu.memory_space<vmem>>, vector<1x32x16xf32>
    %8 = vector.shape_cast %7 : vector<1x32x16xf32> to vector<32x16xf32>
    %c0_9 = arith.constant 0 : index
    %c0_10 = arith.constant 0 : index
    %c0_11 = arith.constant 0 : index
    %9 = vector.load %arg4[%c0_9, %c0_10, %c0_11] : memref<4x32x16xf32, #tpu.memory_space<vmem>>, vector<1x32x16xf32>
    %10 = vector.shape_cast %9 : vector<1x32x16xf32> to vector<32x16xf32>
    %cst_12 = arith.constant dense<0.000000e+00> : vector<8x16xf32>
    %11 = tpu.matmul %3, %6, %cst_12 {dimension_numbers = #tpu.dot_dimension_numbers<[1], [0], [0], [1], [0, 0, 1, 1], [], []>} : vector<8x32xf32>, vector<32x16xf32>, vector<8x16xf32> -> vector<8x16xf32>
    %cst_13 = arith.constant dense<0.000000e+00> : vector<8x16xf32>
    %12 = tpu.matmul %1, %8, %cst_13 {dimension_numbers = #tpu.dot_dimension_numbers<[1], [0], [0], [1], [0, 0, 1, 1], [], []>} : vector<8x32xf32>, vector<32x16xf32>, vector<8x16xf32> -> vector<8x16xf32>
    %cst_14 = arith.constant dense<0.000000e+00> : vector<8x16xf32>
    %13 = tpu.matmul %1, %10, %cst_14 {dimension_numbers = #tpu.dot_dimension_numbers<[1], [0], [0], [1], [0, 0, 1, 1], [], []>} : vector<8x32xf32>, vector<32x16xf32>, vector<8x16xf32> -> vector<8x16xf32>
    %cst_15 = arith.constant dense<0.000000e+00> : vector<8x8xf32>
    %14 = tpu.matmul %11, %12, %cst_15 {dimension_numbers = #tpu.dot_dimension_numbers<[1], [1], [0], [0], [0, 0, 1, 0], [], []>} : vector<8x16xf32>, vector<8x16xf32>, vector<8x8xf32> -> vector<8x8xf32>
    %cst_16 = arith.constant dense<0xFF800000> : vector<8xf32>
    %15 = vector.multi_reduction <maximumf>, %14, %cst_16 [1] : vector<8x8xf32> to vector<8xf32>
    %16 = vector.shape_cast %15 : vector<8xf32> to vector<8x1xf32>
    %17 = vector.broadcast %16 : vector<8x1xf32> to vector<8x8xf32>
    %18 = arith.subf %14, %17 : vector<8x8xf32>
    %19 = math.exp %18 : vector<8x8xf32>
    %cst_17 = arith.constant dense<0.000000e+00> : vector<8xf32>
    %20 = vector.multi_reduction <add>, %19, %cst_17 [1] : vector<8x8xf32> to vector<8xf32>
    %21 = vector.shape_cast %20 : vector<8xf32> to vector<8x1xf32>
    %22 = tpu.reciprocal %21 {approx = true} : vector<8x1xf32> -> vector<8x1xf32>
    %23 = vector.broadcast %22 : vector<8x1xf32> to vector<8x8xf32>
    %24 = arith.mulf %19, %23 : vector<8x8xf32>
    %cst_18 = arith.constant dense<0.000000e+00> : vector<8x16xf32>
    %25 = tpu.matmul %24, %13, %cst_18 {dimension_numbers = #tpu.dot_dimension_numbers<[1], [0], [0], [1], [0, 0, 1, 1], [], []>} : vector<8x8xf32>, vector<8x16xf32>, vector<8x16xf32> -> vector<8x16xf32>
    %c0_19 = arith.constant 0 : index
    %c0_20 = arith.constant 0 : index
    %c0_21 = arith.constant 0 : index
    %26 = vector.load %arg5[%c0_19, %c0_20, %c0_21] : memref<4x16x32xf32, #tpu.memory_space<vmem>>, vector<1x16x32xf32>
    %27 = vector.shape_cast %26 : vector<1x16x32xf32> to vector<16x32xf32>
    %cst_22 = arith.constant dense<0.000000e+00> : vector<8x32xf32>
    %28 = tpu.matmul %25, %27, %cst_22 {dimension_numbers = #tpu.dot_dimension_numbers<[1], [0], [0], [1], [0, 0, 1, 1], [], []>} : vector<8x16xf32>, vector<16x32xf32>, vector<8x32xf32> -> vector<8x32xf32>
    %29 = arith.addf %4, %28 : vector<8x32xf32>
    %c1 = arith.constant 1 : index
    %c0_23 = arith.constant 0 : index
    %c0_24 = arith.constant 0 : index
    %30 = vector.load %arg2[%c1, %c0_23, %c0_24] : memref<4x32x16xf32, #tpu.memory_space<vmem>>, vector<1x32x16xf32>
    %31 = vector.shape_cast %30 : vector<1x32x16xf32> to vector<32x16xf32>
    %c1_25 = arith.constant 1 : index
    %c0_26 = arith.constant 0 : index
    %c0_27 = arith.constant 0 : index
    %32 = vector.load %arg3[%c1_25, %c0_26, %c0_27] : memref<4x32x16xf32, #tpu.memory_space<vmem>>, vector<1x32x16xf32>
    %33 = vector.shape_cast %32 : vector<1x32x16xf32> to vector<32x16xf32>
    %c1_28 = arith.constant 1 : index
    %c0_29 = arith.constant 0 : index
    %c0_30 = arith.constant 0 : index
    %34 = vector.load %arg4[%c1_28, %c0_29, %c0_30] : memref<4x32x16xf32, #tpu.memory_space<vmem>>, vector<1x32x16xf32>
    %35 = vector.shape_cast %34 : vector<1x32x16xf32> to vector<32x16xf32>
    %cst_31 = arith.constant dense<0.000000e+00> : vector<8x16xf32>
    %36 = tpu.matmul %3, %31, %cst_31 {dimension_numbers = #tpu.dot_dimension_numbers<[1], [0], [0], [1], [0, 0, 1, 1], [], []>} : vector<8x32xf32>, vector<32x16xf32>, vector<8x16xf32> -> vector<8x16xf32>
    %cst_32 = arith.constant dense<0.000000e+00> : vector<8x16xf32>
    %37 = tpu.matmul %1, %33, %cst_32 {dimension_numbers = #tpu.dot_dimension_numbers<[1], [0], [0], [1], [0, 0, 1, 1], [], []>} : vector<8x32xf32>, vector<32x16xf32>, vector<8x16xf32> -> vector<8x16xf32>
    %cst_33 = arith.constant dense<0.000000e+00> : vector<8x16xf32>
    %38 = tpu.matmul %1, %35, %cst_33 {dimension_numbers = #tpu.dot_dimension_numbers<[1], [0], [0], [1], [0, 0, 1, 1], [], []>} : vector<8x32xf32>, vector<32x16xf32>, vector<8x16xf32> -> vector<8x16xf32>
    %cst_34 = arith.constant dense<0.000000e+00> : vector<8x8xf32>
    %39 = tpu.matmul %36, %37, %cst_34 {dimension_numbers = #tpu.dot_dimension_numbers<[1], [1], [0], [0], [0, 0, 1, 0], [], []>} : vector<8x16xf32>, vector<8x16xf32>, vector<8x8xf32> -> vector<8x8xf32>
    %cst_35 = arith.constant dense<0xFF800000> : vector<8xf32>
    %40 = vector.multi_reduction <maximumf>, %39, %cst_35 [1] : vector<8x8xf32> to vector<8xf32>
    %41 = vector.shape_cast %40 : vector<8xf32> to vector<8x1xf32>
    %42 = vector.broadcast %41 : vector<8x1xf32> to vector<8x8xf32>
    %43 = arith.subf %39, %42 : vector<8x8xf32>
    %44 = math.exp %43 : vector<8x8xf32>
    %cst_36 = arith.constant dense<0.000000e+00> : vector<8xf32>
    %45 = vector.multi_reduction <add>, %44, %cst_36 [1] : vector<8x8xf32> to vector<8xf32>
    %46 = vector.shape_cast %45 : vector<8xf32> to vector<8x1xf32>
    %47 = tpu.reciprocal %46 {approx = true} : vector<8x1xf32> -> vector<8x1xf32>
    %48 = vector.broadcast %47 : vector<8x1xf32> to vector<8x8xf32>
    %49 = arith.mulf %44, %48 : vector<8x8xf32>
    %cst_37 = arith.constant dense<0.000000e+00> : vector<8x16xf32>
    %50 = tpu.matmul %49, %38, %cst_37 {dimension_numbers = #tpu.dot_dimension_numbers<[1], [0], [0], [1], [0, 0, 1, 1], [], []>} : vector<8x8xf32>, vector<8x16xf32>, vector<8x16xf32> -> vector<8x16xf32>
    %c1_38 = arith.constant 1 : index
    %c0_39 = arith.constant 0 : index
    %c0_40 = arith.constant 0 : index
    %51 = vector.load %arg5[%c1_38, %c0_39, %c0_40] : memref<4x16x32xf32, #tpu.memory_space<vmem>>, vector<1x16x32xf32>
    %52 = vector.shape_cast %51 : vector<1x16x32xf32> to vector<16x32xf32>
    %cst_41 = arith.constant dense<0.000000e+00> : vector<8x32xf32>
    %53 = tpu.matmul %50, %52, %cst_41 {dimension_numbers = #tpu.dot_dimension_numbers<[1], [0], [0], [1], [0, 0, 1, 1], [], []>} : vector<8x16xf32>, vector<16x32xf32>, vector<8x32xf32> -> vector<8x32xf32>
    %54 = arith.addf %29, %53 : vector<8x32xf32>
    %c2 = arith.constant 2 : index
    %c0_42 = arith.constant 0 : index
    %c0_43 = arith.constant 0 : index
    %55 = vector.load %arg2[%c2, %c0_42, %c0_43] : memref<4x32x16xf32, #tpu.memory_space<vmem>>, vector<1x32x16xf32>
    %56 = vector.shape_cast %55 : vector<1x32x16xf32> to vector<32x16xf32>
    %c2_44 = arith.constant 2 : index
    %c0_45 = arith.constant 0 : index
    %c0_46 = arith.constant 0 : index
    %57 = vector.load %arg3[%c2_44, %c0_45, %c0_46] : memref<4x32x16xf32, #tpu.memory_space<vmem>>, vector<1x32x16xf32>
    %58 = vector.shape_cast %57 : vector<1x32x16xf32> to vector<32x16xf32>
    %c2_47 = arith.constant 2 : index
    %c0_48 = arith.constant 0 : index
    %c0_49 = arith.constant 0 : index
    %59 = vector.load %arg4[%c2_47, %c0_48, %c0_49] : memref<4x32x16xf32, #tpu.memory_space<vmem>>, vector<1x32x16xf32>
    %60 = vector.shape_cast %59 : vector<1x32x16xf32> to vector<32x16xf32>
    %cst_50 = arith.constant dense<0.000000e+00> : vector<8x16xf32>
    %61 = tpu.matmul %3, %56, %cst_50 {dimension_numbers = #tpu.dot_dimension_numbers<[1], [0], [0], [1], [0, 0, 1, 1], [], []>} : vector<8x32xf32>, vector<32x16xf32>, vector<8x16xf32> -> vector<8x16xf32>
    %cst_51 = arith.constant dense<0.000000e+00> : vector<8x16xf32>
    %62 = tpu.matmul %1, %58, %cst_51 {dimension_numbers = #tpu.dot_dimension_numbers<[1], [0], [0], [1], [0, 0, 1, 1], [], []>} : vector<8x32xf32>, vector<32x16xf32>, vector<8x16xf32> -> vector<8x16xf32>
    %cst_52 = arith.constant dense<0.000000e+00> : vector<8x16xf32>
    %63 = tpu.matmul %1, %60, %cst_52 {dimension_numbers = #tpu.dot_dimension_numbers<[1], [0], [0], [1], [0, 0, 1, 1], [], []>} : vector<8x32xf32>, vector<32x16xf32>, vector<8x16xf32> -> vector<8x16xf32>
    %cst_53 = arith.constant dense<0.000000e+00> : vector<8x8xf32>
    %64 = tpu.matmul %61, %62, %cst_53 {dimension_numbers = #tpu.dot_dimension_numbers<[1], [1], [0], [0], [0, 0, 1, 0], [], []>} : vector<8x16xf32>, vector<8x16xf32>, vector<8x8xf32> -> vector<8x8xf32>
    %cst_54 = arith.constant dense<0xFF800000> : vector<8xf32>
    %65 = vector.multi_reduction <maximumf>, %64, %cst_54 [1] : vector<8x8xf32> to vector<8xf32>
    %66 = vector.shape_cast %65 : vector<8xf32> to vector<8x1xf32>
    %67 = vector.broadcast %66 : vector<8x1xf32> to vector<8x8xf32>
    %68 = arith.subf %64, %67 : vector<8x8xf32>
    %69 = math.exp %68 : vector<8x8xf32>
    %cst_55 = arith.constant dense<0.000000e+00> : vector<8xf32>
    %70 = vector.multi_reduction <add>, %69, %cst_55 [1] : vector<8x8xf32> to vector<8xf32>
    %71 = vector.shape_cast %70 : vector<8xf32> to vector<8x1xf32>
    %72 = tpu.reciprocal %71 {approx = true} : vector<8x1xf32> -> vector<8x1xf32>
    %73 = vector.broadcast %72 : vector<8x1xf32> to vector<8x8xf32>
    %74 = arith.mulf %69, %73 : vector<8x8xf32>
    %cst_56 = arith.constant dense<0.000000e+00> : vector<8x16xf32>
    %75 = tpu.matmul %74, %63, %cst_56 {dimension_numbers = #tpu.dot_dimension_numbers<[1], [0], [0], [1], [0, 0, 1, 1], [], []>} : vector<8x8xf32>, vector<8x16xf32>, vector<8x16xf32> -> vector<8x16xf32>
    %c2_57 = arith.constant 2 : index
    %c0_58 = arith.constant 0 : index
    %c0_59 = arith.constant 0 : index
    %76 = vector.load %arg5[%c2_57, %c0_58, %c0_59] : memref<4x16x32xf32, #tpu.memory_space<vmem>>, vector<1x16x32xf32>
    %77 = vector.shape_cast %76 : vector<1x16x32xf32> to vector<16x32xf32>
    %cst_60 = arith.constant dense<0.000000e+00> : vector<8x32xf32>
    %78 = tpu.matmul %75, %77, %cst_60 {dimension_numbers = #tpu.dot_dimension_numbers<[1], [0], [0], [1], [0, 0, 1, 1], [], []>} : vector<8x16xf32>, vector<16x32xf32>, vector<8x32xf32> -> vector<8x32xf32>
    %79 = arith.addf %54, %78 : vector<8x32xf32>
    %c3 = arith.constant 3 : index
    %c0_61 = arith.constant 0 : index
    %c0_62 = arith.constant 0 : index
    %80 = vector.load %arg2[%c3, %c0_61, %c0_62] : memref<4x32x16xf32, #tpu.memory_space<vmem>>, vector<1x32x16xf32>
    %81 = vector.shape_cast %80 : vector<1x32x16xf32> to vector<32x16xf32>
    %c3_63 = arith.constant 3 : index
    %c0_64 = arith.constant 0 : index
    %c0_65 = arith.constant 0 : index
    %82 = vector.load %arg3[%c3_63, %c0_64, %c0_65] : memref<4x32x16xf32, #tpu.memory_space<vmem>>, vector<1x32x16xf32>
    %83 = vector.shape_cast %82 : vector<1x32x16xf32> to vector<32x16xf32>
    %c3_66 = arith.constant 3 : index
    %c0_67 = arith.constant 0 : index
    %c0_68 = arith.constant 0 : index
    %84 = vector.load %arg4[%c3_66, %c0_67, %c0_68] : memref<4x32x16xf32, #tpu.memory_space<vmem>>, vector<1x32x16xf32>
    %85 = vector.shape_cast %84 : vector<1x32x16xf32> to vector<32x16xf32>
    %cst_69 = arith.constant dense<0.000000e+00> : vector<8x16xf32>
    %86 = tpu.matmul %3, %81, %cst_69 {dimension_numbers = #tpu.dot_dimension_numbers<[1], [0], [0], [1], [0, 0, 1, 1], [], []>} : vector<8x32xf32>, vector<32x16xf32>, vector<8x16xf32> -> vector<8x16xf32>
    %cst_70 = arith.constant dense<0.000000e+00> : vector<8x16xf32>
    %87 = tpu.matmul %1, %83, %cst_70 {dimension_numbers = #tpu.dot_dimension_numbers<[1], [0], [0], [1], [0, 0, 1, 1], [], []>} : vector<8x32xf32>, vector<32x16xf32>, vector<8x16xf32> -> vector<8x16xf32>
    %cst_71 = arith.constant dense<0.000000e+00> : vector<8x16xf32>
    %88 = tpu.matmul %1, %85, %cst_71 {dimension_numbers = #tpu.dot_dimension_numbers<[1], [0], [0], [1], [0, 0, 1, 1], [], []>} : vector<8x32xf32>, vector<32x16xf32>, vector<8x16xf32> -> vector<8x16xf32>
    %cst_72 = arith.constant dense<0.000000e+00> : vector<8x8xf32>
    %89 = tpu.matmul %86, %87, %cst_72 {dimension_numbers = #tpu.dot_dimension_numbers<[1], [1], [0], [0], [0, 0, 1, 0], [], []>} : vector<8x16xf32>, vector<8x16xf32>, vector<8x8xf32> -> vector<8x8xf32>
    %cst_73 = arith.constant dense<0xFF800000> : vector<8xf32>
    %90 = vector.multi_reduction <maximumf>, %89, %cst_73 [1] : vector<8x8xf32> to vector<8xf32>
    %91 = vector.shape_cast %90 : vector<8xf32> to vector<8x1xf32>
    %92 = vector.broadcast %91 : vector<8x1xf32> to vector<8x8xf32>
    %93 = arith.subf %89, %92 : vector<8x8xf32>
    %94 = math.exp %93 : vector<8x8xf32>
    %cst_74 = arith.constant dense<0.000000e+00> : vector<8xf32>
    %95 = vector.multi_reduction <add>, %94, %cst_74 [1] : vector<8x8xf32> to vector<8xf32>
    %96 = vector.shape_cast %95 : vector<8xf32> to vector<8x1xf32>
    %97 = tpu.reciprocal %96 {approx = true} : vector<8x1xf32> -> vector<8x1xf32>
    %98 = vector.broadcast %97 : vector<8x1xf32> to vector<8x8xf32>
    %99 = arith.mulf %94, %98 : vector<8x8xf32>
    %cst_75 = arith.constant dense<0.000000e+00> : vector<8x16xf32>
    %100 = tpu.matmul %99, %88, %cst_75 {dimension_numbers = #tpu.dot_dimension_numbers<[1], [0], [0], [1], [0, 0, 1, 1], [], []>} : vector<8x8xf32>, vector<8x16xf32>, vector<8x16xf32> -> vector<8x16xf32>
    %c3_76 = arith.constant 3 : index
    %c0_77 = arith.constant 0 : index
    %c0_78 = arith.constant 0 : index
    %101 = vector.load %arg5[%c3_76, %c0_77, %c0_78] : memref<4x16x32xf32, #tpu.memory_space<vmem>>, vector<1x16x32xf32>
    %102 = vector.shape_cast %101 : vector<1x16x32xf32> to vector<16x32xf32>
    %cst_79 = arith.constant dense<0.000000e+00> : vector<8x32xf32>
    %103 = tpu.matmul %100, %102, %cst_79 {dimension_numbers = #tpu.dot_dimension_numbers<[1], [0], [0], [1], [0, 0, 1, 1], [], []>} : vector<8x16xf32>, vector<16x32xf32>, vector<8x32xf32> -> vector<8x32xf32>
    %104 = arith.addf %79, %103 : vector<8x32xf32>
    %c0_80 = arith.constant 0 : index
    %c0_81 = arith.constant 0 : index
    %105 = vector.load %arg6[%c0_80, %c0_81] : memref<1x32xf32, #tpu.memory_space<vmem>>, vector<1x32xf32>
    %106 = vector.broadcast %105 : vector<1x32xf32> to vector<8x32xf32>
    %107 = arith.addf %104, %106 : vector<8x32xf32>
    %c0_82 = arith.constant 0 : index
    %c0_83 = arith.constant 0 : index
    %c0_84 = arith.constant 0 : index
    %108 = vector.load %arg7[%c0_82, %c0_83, %c0_84] : memref<1x8x32xf32, #tpu.memory_space<vmem>>, vector<1x8x32xf32>
    %109 = vector.shape_cast %108 : vector<1x8x32xf32> to vector<8x32xf32>
    %110 = vector.shape_cast %107 : vector<8x32xf32> to vector<1x8x32xf32>
    tpu.vector_store %arg7[%c0_82, %c0_83, %c0_84], %110 {strides = array<i32>} : memref<1x8x32xf32, #tpu.memory_space<vmem>>, vector<1x8x32xf32>,
    return
  }
  func.func @transform_0(%arg0: i32) -> (i32, i32, i32) {
    %c0_i32 = arith.constant 0 : i32
    %c0_i32_0 = arith.constant 0 : i32
    %c0_i32_1 = arith.constant 0 : i32
    return %arg0, %c0_i32, %c0_i32_0 : i32, i32, i32
  }
  func.func @transform_1(%arg0: i32) -> (i32, i32, i32) {
    %c0_i32 = arith.constant 0 : i32
    %c0_i32_0 = arith.constant 0 : i32
    %c0_i32_1 = arith.constant 0 : i32
    %c0_i32_2 = arith.constant 0 : i32
    return %c0_i32, %c0_i32_0, %c0_i32_1 : i32, i32, i32
  }
  func.func @transform_2(%arg0: i32) -> (i32, i32, i32) {
    %c0_i32 = arith.constant 0 : i32
    %c0_i32_0 = arith.constant 0 : i32
    %c0_i32_1 = arith.constant 0 : i32
    %c0_i32_2 = arith.constant 0 : i32
    return %c0_i32, %c0_i32_0, %c0_i32_1 : i32, i32, i32
  }
  func.func @transform_3(%arg0: i32) -> (i32, i32, i32) {
    %c0_i32 = arith.constant 0 : i32
    %c0_i32_0 = arith.constant 0 : i32
    %c0_i32_1 = arith.constant 0 : i32
    %c0_i32_2 = arith.constant 0 : i32
    return %c0_i32, %c0_i32_0, %c0_i32_1 : i32, i32, i32
  }
  func.func @transform_4(%arg0: i32) -> (i32, i32, i32) {
    %c0_i32 = arith.constant 0 : i32
    %c0_i32_0 = arith.constant 0 : i32
    %c0_i32_1 = arith.constant 0 : i32
    %c0_i32_2 = arith.constant 0 : i32
    return %c0_i32, %c0_i32_0, %c0_i32_1 : i32, i32, i32
  }
  func.func @transform_5(%arg0: i32) -> (i32, i32) {
    %c0_i32 = arith.constant 0 : i32
    %c0_i32_0 = arith.constant 0 : i32
    %c0_i32_1 = arith.constant 0 : i32
    return %c0_i32, %c0_i32_0 : i32, i32
  }
  func.func @transform_6(%arg0: i32) -> (i32, i32, i32) {
    %c0_i32 = arith.constant 0 : i32
    %c0_i32_0 = arith.constant 0 : i32
    %c0_i32_1 = arith.constant 0 : i32
    return %arg0, %c0_i32, %c0_i32_0 : i32, i32, i32
  }
}

</mosaic_0001>

<bundles_post_ra>
// kernel: tpu_custom_call.1
= control target key start
LH: loop header
LB: loop body
LE: loop exit
PB: predicated region body
PF: predicated region fallthrough
CT: control target
= control target key end

     0   :  { %11 = vsyncpa [#allocation3], 0  ;;  %s3138_s0 = inlined_call_operand.vmem [shape: f32[2,8,32], index: 0, kind: input, shape index: {}]   ;;  %s3139_s1 = inlined_call_operand.vmem [shape: f32[4,32,16], index: 1, kind: input, shape index: {}]   ;;  %s3140_s2 = inlined_call_operand.vmem [shape: f32[4,32,16], index: 2, kind: input, shape index: {}]   ;;  %s3141_s3 = inlined_call_operand.vmem [shape: f32[4,32,16], index: 3, kind: input, shape index: {}]   ;;  %s3142_s4 = inlined_call_operand.vmem [shape: f32[4,16,32], index: 4, kind: input, shape index: {}]   ;;  %s3143_s5 = inlined_call_operand.vmem [shape: f32[1,32], index: 5, kind: input, shape index: {}]   ;;  %s3144_s6 = inlined_call_operand.hbm [shape: f32[2,8,32], index: 6, kind: output, shape index: {}]  }
   0x1   :  { %13 = vsyncpa [#allocation3 + $0x1], 0  ;;  %s2708_s21 = smov 0   ;;  %s2710_s22 = smov 0  }
   0x2   :  { %s2712_s23 = smov 0   ;;  %s2714_s24 = smov 0  }
   0x3 LB: > { %s2729_s25 = sadd.s32 4294967295, %s2668_s24   ;;  %s2182_s26 = sadd.s32 4294967294, %s2668_s24   ;;  %s2668_s24 = sphi %s2714_s24, %s3150_s24   ;;  %s2664_s23 = sphi %s2712_s23, %s3149_s23   ;;  %s2660_s22 = sphi %s2710_s22, %s3148_s22   ;;  %s2656_s21 = sphi %s2708_s21, %s3147_s21  }
   0x4   : > { %s2733_s27 = sadd.s32 1, %s2668_s24   ;;  %s157_s28 = sadd.s32 1, %s2664_s23 }
   0x5   : > { %s154_s29 = ssub.s32 %s2668_s24, %s2733_s27  ;;  %p167_p0 = scmp.ne.s32.totalorder %s2664_s23, %s2660_s22 }
   0x6   : > { %p155_p1 = scmp.eq.s32.totalorder %s154_s29, 0  ;;  %p168_p2 = scmp.eq.s32.totalorder %s2729_s25, 1 }
   0x7   : > { %p173_p3 = scmp.ne.s32.totalorder %s2660_s22, %s2656_s21  ;;  %p174_p4 = scmp.eq.s32.totalorder %s2182_s26, 1 }
   0x8   : > { %s2744_s30 = scalar_select %p155_p1, %s2664_s23, %s157_s28  }
   0x9   : > { %p2746_p5 = por %p168_p2, %p167_p0  ;;  %p2750_p6 = por %p174_p4, %p173_p3 }
   0xa   : > { %p2185_p7 = scmp.ge.s32.totalorder %s2668_s24, 1  ;;  %p214_p8 = scmp.lt.s32.totalorder %s2668_s24, 3 }
   0xc   : > { %p215_p9 = pnand %p2185_p7, %p214_p8 }
   0xd   : > { %p243_p10 = scmp.lt.s32.totalorder (!%p215_p9), %s2729_s25, 1  ;;  %s240_s26 = sand.u32 (!%p215_p9), 1, %s2660_s22  }
   0xe   : > { %218 = sbr.rel (%p215_p9) target bundleno = 3643 (0xe3b), region = 44  ;;  %s2260_s10 = sshll.u32 (!%p215_p9), %s2729_s25, 7 }
   0xf   : > { %s2121_s15 = scalar_lea.hbm (!%p215_p9), %s3144_s6, %s2260_s10  ;;  %s2110_s16 = scalar_lea.sflag (!%p215_p9), [#allocation3], %s240_s26 }
  0x10   : > { %s2672_s18 = smov (!%p215_p9), [#allocation2]  }
  0x13   : > { %v256_v0 = vld [vmem:[%s3140_s2 + $0x18] sm:$0xff]  ;;  %v2670_v2 = vmov 0.0   ;;  %v255_v3 = vld [vmem:[%s3140_s2 + $0x10] sm:$0xff]  ;;  %s244_s17 = scalar_select %p243_p10, %s2729_s25, 1  ;;  %v254_v5 = vld [vmem:[%s3140_s2 + $0x8] sm:$0xff]  ;;  %vm261_vm0 = vcmask 261120  }
  0x14   : > { %v252_v1 = vld [vmem:[%s3139_s1 + $0x18] sm:$0xff]  ;;  %2362 = vmatprep.subr.mxu1 %v2670_v2  ;;  %2351 = vmatprep.subr.mxu0 %v2670_v2  ;;  %v251_v4 = vld [vmem:[%s3139_s1 + $0x10] sm:$0xff]  ;;  %v250_v6 = vld [vmem:[%s3139_s1 + $0x8] sm:$0xff]  ;;  %vm2671_vm1 = vmmov 0   ;;  %vm478_vm2 = vcmask 130048   ;;  %vm555_vm3 = vcmask 64512  }
  0x15   : > { %2363 = vmatpush3.msra.mxu1 %v256_v0  ;;  %2352 = vmatpush3.msra.mxu0 %v252_v1  ;;  %s2187_s28 = sshll.u32 %s244_s17, 3  ;;  %v253_v7 = vld [vmem:[%s3140_s2] sm:$0xff]  ;;  %v260_v15 = vld [vmem:[%s3141_s3 + $0x18] sm:$0xff]  ;;  %v259_v16 = vld [vmem:[%s3141_s3 + $0x10] sm:$0xff]  ;;  %s2612_s25 = sshll.u32 %s2672_s18, 4  ;;  %s2613_s25 = int_to_ptr.vmem [resolvable:$false] %s2612_s25 }
  0x16   : > { %2364 = vmatprep.subr.mxu1 %v2670_v2  ;;  %2353 = vmatprep.subr.mxu0 %v2670_v2  ;;  %s246_s12 = scalar_lea.vmem %s3138_s0, %s2187_s28  ;;  %v249_v8 = vld [vmem:[%s3139_s1] sm:$0xff]  ;;  %v258_v17 = vld [vmem:[%s3141_s3 + $0x8] sm:$0xff]  ;;  %v2197_v29 = vld [vmem:[%s3139_s1 + $0x38] sm:$0xff]  ;;  %s2186_s28 = sshll.u32 %s240_s26, 3 }
  0x17   : > { %2365 = vmatpush3.msra.mxu1 %v255_v3  ;;  %2354 = vmatpush3.msra.mxu0 %v251_v4  ;;  %v2791_v9 = vld [vmem:[%s246_s12] sm:$0xff]  ;;  %v2196_v30 = vld [vmem:[%s3139_s1 + $0x30] sm:$0xff]  ;;  %v2195_v31 = vld [vmem:[%s3139_s1 + $0x28] sm:$0xff]  ;;  %s242_s11 = scalar_lea.vmem [#allocation2], %s2186_s28  ;;  %s2614_s19 = scalar_lea.vmem %s2613_s25, 256 }
  0x18   : > { %2366 = vmatprep.subr.mxu1 %v2670_v2  ;;  %2355 = vmatprep.subr.mxu0 %v2670_v2  ;;  %v2796_v10 = vmul.f32 0.25, %v2791_v9  ;;  %v257_v18 = vld [vmem:[%s3141_s3] sm:$0xff]  ;;  %v2201_v36 = vld [vmem:[%s3140_s2 + $0x38] sm:$0xff]  ;;  %v2200_v37 = vld [vmem:[%s3140_s2 + $0x30] sm:$0xff]  ;;  %s2123_s12 = sshll.u32 %s242_s11, 4  ;;  %s2124_s12 = int_to_ptr.vmem [resolvable:$true] %s2123_s12 }
  0x19   : > { %2367 = vmatpush3.msra.mxu1 %v254_v5  ;;  %2356 = vmatpush3.msra.mxu0 %v250_v6  ;;  %v2194_v32 = vld [vmem:[%s3139_s1 + $0x20] sm:$0xff]  ;;  %v2199_v38 = vld [vmem:[%s3140_s2 + $0x28] sm:$0xff]  ;;  %v2205_v46 = vld [vmem:[%s3141_s3 + $0x38] sm:$0xff]  ;;  %s2608_s17 = scalar_lea.vmem %s2124_s12, 128  ;;  %p2615_p0 = scmp.lt.s32.totalorder %s2124_s12, %s2613_s25 }
  0x1a   : > { %2368 = vmatprep.subr.mxu1 %v2670_v2  ;;  %2357 = vmatprep.subr.mxu0 %v2670_v2  ;;  %v2198_v39 = vld [vmem:[%s3140_s2 + $0x20] sm:$0xff]  ;;  %v2204_v47 = vld [vmem:[%s3141_s3 + $0x30] sm:$0xff]  ;;  %v2203_v48 = vld [vmem:[%s3141_s3 + $0x28] sm:$0xff]  ;;  %p2609_p11 = scmp.ne.s32.totalorder %s2124_s12, %s2608_s17  ;;  %p2616_p1 = scmp.lt.s32.totalorder %s2614_s19, %s2608_s17 }
  0x1b   : > { %2369 = vmatpush3.msra.mxu1 %v253_v7  ;;  %2370 = vmatprep.mubr.msk.f32.mxu1 %vm2671_vm1, %v2670_v2  ;;  %v2202_v49 = vld [vmem:[%s3141_s3 + $0x20] sm:$0xff]  ;;  %v2213_v60 = vld [vmem:[%s3142_s4 + $0x18] sm:$0xff]  ;;  %v2212_v61 = vld [vmem:[%s3142_s4 + $0x10] sm:$0xff] }
  0x1c   : > { %2358 = vmatpush3.msra.mxu0 %v249_v8  ;;  %2359 = vmatprep.mubr.msk.f32.mxu0 %vm2671_vm1, %v2670_v2  ;;  %v641_v1 = vld [vmem:[%s3142_s4 + $0x8] sm:$0xff]  ;;  %v640_v3 = vld [vmem:[%s3142_s4] sm:$0xff]  ;;  %v2223_v4 = vld [vmem:[%s3140_s2 + $0x58] sm:$0xff]  ;;  %p2610_p12 = pnand %p2609_p11, %p2746_p5  ;;  %p2617_p2 = por %p2616_p1, %p2615_p0 }
  0x1d   : > { %2371 = vmatmul.mubr.msk.f32.vlgmr.msra.gmra.mxu1 %vm261_vm0, %v2791_v9  ;;  %2360 = vmatmul.mubr.msk.f32.vlgmr.msra.gmra.mxu0 %vm261_vm0, %v2796_v10  ;;  %v2222_v5 = vld [vmem:[%s3140_s2 + $0x50] sm:$0xff]  ;;  %v2221_v6 = vld [vmem:[%s3140_s2 + $0x48] sm:$0xff]  ;;  %v2220_v7 = vld [vmem:[%s3140_s2 + $0x40] sm:$0xff] }
  0x1e   : > { %2384 = vmatprep.subr.mxu1 %v2670_v2  ;;  %2386 = vmatprep.mubr.msk.f32.mxu1 %vm2671_vm1, %v2670_v2  ;;  %v2219_v8 = vld [vmem:[%s3139_s1 + $0x58] sm:$0xff]  ;;  %p2611_p13 = pneg %p2610_p12 }
  0x1f   : > { %2373 = vmatprep.subr.mxu0 %v2670_v2  ;;  %2381 = vmatprep.mubr.msk.f32.mxu0 %vm2671_vm1, %v2670_v2 }
  0x20   : > { %2374 = vmatpush3.msra.mxu0 %v260_v15  ;;  %p2618_p3 = pnand %p2617_p2, %p2611_p13 }
  0x21   : > { %2375 = vmatprep.subr.mxu0 %v2670_v2 }
  0x22   : > { %2376 = vmatpush3.msra.mxu0 %v259_v16  ;;  %v2216_v16 = vld [vmem:[%s3139_s1 + $0x40] sm:$0xff] }
  0x23   : > { %2377 = vmatprep.subr.mxu0 %v2670_v2 }
  0x24   : > { %2378 = vmatpush3.msra.mxu0 %v258_v17 }
  0x25   : > { %2379 = vmatprep.subr.mxu0 %v2670_v2 }
  0x26   : > { %2380 = vmatpush3.msra.mxu0 %v257_v18 }
  0x27   : > { %2382 = vmatmul.mubr.msk.f32.vlgmr.msra.gmra.mxu0 %vm261_vm0, %v2791_v9  ;;  %2394 = vmatprep.subr.mxu0 %v2670_v2 }
  0x28   : > { %2402 = vmatprep.mubr.msk.f32.mxu0 %vm2671_vm1, %v2670_v2  ;;  %2395 = vmatpush3.msra.mxu0 %v2197_v29 }
  0x29   : > { %2396 = vmatprep.subr.mxu0 %v2670_v2 }
  0x2a   : > { %2397 = vmatpush3.msra.mxu0 %v2196_v30 }
  0x2b   : > { %2398 = vmatprep.subr.mxu0 %v2670_v2 }
  0x2c   : > { %2399 = vmatpush3.msra.mxu0 %v2195_v31 }
  0x2d   : > { %2400 = vmatprep.subr.mxu0 %v2670_v2 }
  0x2e   : > { %2401 = vmatpush3.msra.mxu0 %v2194_v32 }
  0x2f   : > { %2403 = vmatmul.mubr.msk.f32.vlgmr.msra.gmra.mxu0 %vm261_vm0, %v2796_v10  ;;  %2416 = vmatprep.subr.mxu0 %v2670_v2 }
  0x30   : > { %2424 = vmatprep.mubr.msk.f32.mxu0 %vm2671_vm1, %v2670_v2  ;;  %2417 = vmatpush3.msra.mxu0 %v2205_v46  ;;  %v2237_v46 = vld [vmem:[%s3139_s1 + $0x60] sm:$0xff] }
  0x31   : > { %2418 = vmatprep.subr.mxu0 %v2670_v2 }
  0x32   : > { %2419 = vmatpush3.msra.mxu0 %v2204_v47  ;;  %v2244_v47 = vld [vmem:[%s3140_s2 + $0x78] sm:$0xff] }
  0x33   : > { %2420 = vmatprep.subr.mxu0 %v2670_v2 }
  0x34   : > { %2421 = vmatpush3.msra.mxu0 %v2203_v48 }
  0x35   : > { %2422 = vmatprep.subr.mxu0 %v2670_v2 }
  0x36   : > { %2423 = vmatpush3.msra.mxu0 %v2202_v49  ;;  %v2243_v49 = vld [vmem:[%s3140_s2 + $0x70] sm:$0xff] }
  0x37   : > { %2425 = vmatmul.mubr.msk.f32.vlgmr.msra.gmra.mxu0 %vm261_vm0, %v2791_v9  ;;  %2437 = vmatprep.subr.mxu0 %v2670_v2 }
  0x38   : > { %2441 = vmatprep.mubr.msk.f32.mxu0 %vm2671_vm1, %v2670_v2  ;;  %2438 = vmatpush3.msra.mxu0 %v2213_v60  ;;  %v2248_v60 = vld [vmem:[%s3141_s3 + $0x78] sm:$0xff] }
  0x39   : > { %2439 = vmatprep.subr.mxu0 %v2670_v2 }
  0x3a   : > { %2440 = vmatpush3.msra.mxu0 %v2212_v61  ;;  %v2247_v61 = vld [vmem:[%s3141_s3 + $0x70] sm:$0xff] }
  0x3b   : > { %2451 = vmatprep.subr.mxu0 %v2670_v2 }
  0xdd   : > { %v404_v11 = vpop.f32.mrf.mxu1  ;;  %v331_v12 = vpop.f32.mrf.mxu0 }
  0xde   : > { %2385 = vmatpush3.xpose.msk.msra.mxu1 %vm478_vm2, %v404_v11 }
  0xdf   : > { %v2372_v13 = vpop.f32.mrf.mxu1  ;;  %v2361_v14 = vpop.f32.mrf.mxu0  ;;  %2389 = vmatprep.subr.mxu1 %v2670_v2 }
  0xe0   : > { %v2217_v14 = vld [vmem:[%s3139_s1 + $0x48] sm:$0xff] }
  0xe1   : > { %2387 = vmatmul.mubr.msk.f32.vlgmr.msra.gmra.mxu1 %vm478_vm2, %v331_v12  ;;  %v2218_v12 = vld [vmem:[%s3139_s1 + $0x50] sm:$0xff] }
  0xe2   : > { %2391 = vmatprep.mubr.msk.f32.mxu1 %vm2671_vm1, %v2670_v2 }
  0xe7   : > { %v474_v27 = vpop.f32.mrf.mxu0 }
  0xe8   : > { %2390 = vmatpush3.msra.mxu1 %v474_v27  ;;  %v2224_v27 = vld [vmem:[%s3141_s3 + $0x40] sm:$0xff] }
  0xe9   : > { %v2383_v28 = vpop.f32.mrf.mxu0  ;;  %2405 = vmatprep.subr.mxu1 %v2670_v2 }
  0xef   : > { %v723_v40 = vpop.f32.mrf.mxu0 }
  0xf1   : > { %v2404_v41 = vpop.f32.mrf.mxu0 }
  0xf7   : > { %v863_v58 = vpop.f32.mrf.mxu0 }
  0xf9   : > { %v2426_v59 = vpop.f32.mrf.mxu0 }
 0x1a1   : > { %v551_v19 = vpop.f32.mrf.mxu1 }
 0x1a2   : > { %v556_v20 = vsel %vm555_vm3, %v551_v19, -inf }
 0x1a3   : > { %557 = vmax.xlane.f32.xlu0 %v556_v20  ;;  %v2388_v21 = vpop.f32.mrf.mxu1 }
 0x22c   : > { %v558_v22 = vpop.xlane.xlu0 %557 }
 0x22d   : > { %v559_v23 = vsub.f32 %v551_v19, %v558_v22 }
 0x22f   : > { %v560_v24 = vmul.f32 1.442695, %v559_v23 }
 0x231   : > { %2592 = vpow2.f32 %v560_v24  ;;  %v2227_v24 = vld [vmem:[%s3141_s3 + $0x58] sm:$0xff] }
 0x23e   : > { %v2593_v25 = vpop.eup %2592 }
 0x23f   : > { %v562_v26 = vsel %vm555_vm3, %v2593_v25, 0.0 }
 0x240   : > { %563 = vadd.xlane.f32.xlu0 %v562_v26  ;;  %v2225_v26 = vld [vmem:[%s3141_s3 + $0x48] sm:$0xff] }
 0x2c9   : > { %v564_v33 = vpop.xlane.xlu0 %563 }
 0x2ca   : > { %2594 = vrcp.f32 %v564_v33 }
 0x2d7   : > { %v2595_v34 = vpop.eup %2594 }
 0x2d8   : > { %v566_v35 = vmul.f32 %v2595_v34, %v2593_v25  ;;  %v2226_v25 = vld [vmem:[%s3141_s3 + $0x50] sm:$0xff] }
 0x2da   : > { %2392 = vmatmul.mubr.msk.f32.vlgmr.msra.gmra.mxu1 %vm555_vm3, %v566_v35 }
 0x2db   : > { %2406 = vmatpush3.msra.mxu1 %v2201_v36  ;;  %2413 = vmatprep.mubr.msk.f32.mxu1 %vm2671_vm1, %v2670_v2 }
 0x2dc   : > { %2407 = vmatprep.subr.mxu1 %v2670_v2 }
 0x2dd   : > { %2408 = vmatpush3.msra.mxu1 %v2200_v37 }
 0x2de   : > { %2409 = vmatprep.subr.mxu1 %v2670_v2 }
 0x2df   : > { %2410 = vmatpush3.msra.mxu1 %v2199_v38  ;;  %v2235_v38 = vld [vmem:[%s3142_s4 + $0x28] sm:$0xff] }
 0x2e0   : > { %2411 = vmatprep.subr.mxu1 %v2670_v2 }
 0x2e1   : > { %2412 = vmatpush3.msra.mxu1 %v2198_v39  ;;  %v2234_v39 = vld [vmem:[%s3142_s4 + $0x20] sm:$0xff] }
 0x2e2   : > { %2414 = vmatmul.mubr.msk.f32.vlgmr.msra.gmra.mxu1 %vm261_vm0, %v2791_v9  ;;  %2427 = vmatprep.subr.mxu1 %v2670_v2 }
 0x2e3   : > { %2429 = vmatprep.mubr.msk.f32.mxu1 %vm2671_vm1, %v2670_v2 }
 0x39a   : > { %v636_v42 = vpop.f32.mrf.mxu1 }
 0x39c   : > { %v2393_v43 = vpop.f32.mrf.mxu1 }
 0x39d   : > { %v2240_v43 = vld [vmem:[%s3139_s1 + $0x78] sm:$0xff] }
 0x3a2   : > { %v793_v44 = vpop.f32.mrf.mxu1 }
 0x3a3   : > { %2428 = vmatpush3.xpose.msk.msra.mxu1 %vm478_vm2, %v793_v44  ;;  %v2239_v44 = vld [vmem:[%s3139_s1 + $0x70] sm:$0xff] }
 0x3a4   : > { %v2415_v45 = vpop.f32.mrf.mxu1  ;;  %2432 = vmatprep.subr.mxu1 %v2670_v2 }
 0x3a5   : > { %v2238_v45 = vld [vmem:[%s3139_s1 + $0x68] sm:$0xff] }
 0x3a6   : > { %2430 = vmatmul.mubr.msk.f32.vlgmr.msra.gmra.mxu1 %vm478_vm2, %v723_v40 }
 0x3a7   : > { %2434 = vmatprep.mubr.msk.f32.mxu1 %vm2671_vm1, %v2670_v2  ;;  %2433 = vmatpush3.msra.mxu1 %v863_v58 }
 0x3a8   : > { %2444 = vmatprep.subr.mxu1 %v2670_v2 }
 0x466   : > { %v939_v50 = vpop.f32.mrf.mxu1 }
 0x467   : > { %v943_v51 = vsel %vm555_vm3, %v939_v50, -inf }
 0x468   : > { %944 = vmax.xlane.f32.xlu1 %v943_v51  ;;  %v2431_v52 = vpop.f32.mrf.mxu1  ;;  %v2241_v51 = vld [vmem:[%s3140_s2 + $0x60] sm:$0xff] }
 0x4f1   : > { %v945_v53 = vpop.xlane.xlu1 %944 }
 0x4f2   : > { %v946_v54 = vsub.f32 %v939_v50, %v945_v53 }
 0x4f4   : > { %v947_v55 = vmul.f32 1.442695, %v946_v54 }
 0x4f6   : > { %2596 = vpow2.f32 %v947_v55 }
 0x503   : > { %v2597_v56 = vpop.eup %2596 }
 0x504   : > { %v949_v57 = vsel %vm555_vm3, %v2597_v56, 0.0 }
 0x505   : > { %950 = vadd.xlane.f32.xlu1 %v949_v57 }
 0x58e   : > { %v951_v62 = vpop.xlane.xlu1 %950 }
 0x58f   : > { %2598 = vrcp.f32 %v951_v62  ;;  %v2246_v62 = vld [vmem:[%s3141_s3 + $0x68] sm:$0xff] }
 0x59c   : > { %v2599_v63 = vpop.eup %2598 }
 0x59d   : > { %v953_v0 = vmul.f32 %v2599_v63, %v2597_v56  ;;  %v2245_v63 = vld [vmem:[%s3141_s3 + $0x60] sm:$0xff] }
 0x59f   : > { %2435 = vmatmul.mubr.msk.f32.vlgmr.msra.gmra.mxu1 %vm555_vm3, %v953_v0 }
 0x5a0   : > { %2445 = vmatpush3.msra.mxu1 %v641_v1  ;;  %2448 = vmatprep.mubr.msk.f32.mxu1 %vm2671_vm1, %v2670_v2 }
 0x5a1   : > { %2446 = vmatprep.subr.mxu1 %v2670_v2 }
 0x5a2   : > { %2447 = vmatpush3.msra.mxu1 %v640_v3 }
 0x5a3   : > { %2449 = vmatmul.mubr.msk.f32.vlgmr.msra.gmra.mxu1 %vm478_vm2, %v636_v42  ;;  %2462 = vmatprep.subr.mxu1 %v2670_v2 }
 0x5a4   : > { %2463 = vmatpush3.msra.mxu1 %v2223_v4  ;;  %2470 = vmatprep.mubr.msk.f32.mxu1 %vm2671_vm1, %v2670_v2 }
 0x5a5   : > { %2464 = vmatprep.subr.mxu1 %v2670_v2 }
 0x5a6   : > { %2465 = vmatpush3.msra.mxu1 %v2222_v5 }
 0x5a7   : > { %2466 = vmatprep.subr.mxu1 %v2670_v2 }
 0x5a8   : > { %2467 = vmatpush3.msra.mxu1 %v2221_v6 }
 0x5a9   : > { %2468 = vmatprep.subr.mxu1 %v2670_v2 }
 0x5aa   : > { %2469 = vmatpush3.msra.mxu1 %v2220_v7 }
 0x5ab   : > { %2471 = vmatmul.mubr.msk.f32.vlgmr.msra.gmra.mxu1 %vm261_vm0, %v2791_v9  ;;  %2484 = vmatprep.subr.mxu1 %v2670_v2 }
 0x5ac   : > { %2486 = vmatprep.mubr.msk.f32.mxu1 %vm2671_vm1, %v2670_v2 }
 0x65f   : > { %v1023_v11 = vpop.f32.mrf.mxu1 }
 0x660   : > { %2442 = vmatmul.mubr.msk.f32.vlgmr.msra.gmra.mxu0 %vm478_vm2, %v1023_v11 }
 0x661   : > { %2452 = vmatpush3.msra.mxu0 %v2219_v8  ;;  %v2436_v13 = vpop.f32.mrf.mxu1  ;;  %2459 = vmatprep.mubr.msk.f32.mxu0 %vm2671_vm1, %v2670_v2 }
 0x662   : > { %2453 = vmatprep.subr.mxu0 %v2670_v2 }
 0x663   : > { %2454 = vmatpush3.msra.mxu0 %v2218_v12  ;;  %v2966_v15 = vpop.f32.mrf.mxu1  ;;  %v2256_v12 = vld [vmem:[%s3142_s4 + $0x38] sm:$0xff] }
 0x664   : > { %2455 = vmatprep.subr.mxu0 %v2670_v2 }
 0x665   : > { %2456 = vmatpush3.msra.mxu0 %v2217_v14  ;;  %v2450_v17 = vpop.f32.mrf.mxu1 }
 0x666   : > { %2457 = vmatprep.subr.mxu0 %v2670_v2 }
 0x667   : > { %2458 = vmatpush3.msra.mxu0 %v2216_v16  ;;  %v2255_v16 = vld [vmem:[%s3142_s4 + $0x30] sm:$0xff] }
 0x668   : > { %2460 = vmatmul.mubr.msk.f32.vlgmr.msra.gmra.mxu0 %vm261_vm0, %v2796_v10  ;;  %2473 = vmatprep.subr.mxu0 %v2670_v2 }
 0x669   : > { %2481 = vmatprep.mubr.msk.f32.mxu0 %vm2671_vm1, %v2670_v2  ;;  %2474 = vmatpush3.msra.mxu0 %v2227_v24 }
 0x66a   : > { %2475 = vmatprep.subr.mxu0 %v2670_v2 }
 0x66b   : > { %v1327_v18 = vpop.f32.mrf.mxu1  ;;  %2476 = vmatpush3.msra.mxu0 %v2226_v25 }
 0x66c   : > { %2485 = vmatpush3.xpose.msk.msra.mxu1 %vm478_vm2, %v1327_v18  ;;  %2477 = vmatprep.subr.mxu0 %v2670_v2 }
 0x66d   : > { %v2472_v19 = vpop.f32.mrf.mxu1  ;;  %2489 = vmatprep.subr.mxu1 %v2670_v2  ;;  %2478 = vmatpush3.msra.mxu0 %v2225_v26 }
 0x66e   : > { %2479 = vmatprep.subr.mxu0 %v2670_v2 }
 0x66f   : > { %2480 = vmatpush3.msra.mxu0 %v2224_v27 }
 0x670   : > { %2482 = vmatmul.mubr.msk.f32.vlgmr.msra.gmra.mxu0 %vm261_vm0, %v2791_v9  ;;  %2494 = vmatprep.subr.mxu0 %v2670_v2 }
 0x671   : > { %2498 = vmatprep.mubr.msk.f32.mxu0 %vm2671_vm1, %v2670_v2  ;;  %2495 = vmatpush3.msra.mxu0 %v2235_v38 }
 0x672   : > { %2496 = vmatprep.subr.mxu0 %v2670_v2 }
 0x673   : > { %2497 = vmatpush3.msra.mxu0 %v2234_v39 }
 0x674   : > { %2512 = vmatprep.subr.mxu0 %v2670_v2 }
 0x720   : > { %v2980_v20 = vpop.f32.mrf.mxu0 }
 0x721   : > { %v1173_v54 = vadd.f32 %v2966_v15, %v2980_v20 }
 0x722   : > { %v2443_v21 = vpop.f32.mrf.mxu0 }
 0x728   : > { %v1257_v22 = vpop.f32.mrf.mxu0 }
 0x729   : > { %2487 = vmatmul.mubr.msk.f32.vlgmr.msra.gmra.mxu1 %vm478_vm2, %v1257_v22 }
 0x72a   : > { %v2461_v23 = vpop.f32.mrf.mxu0  ;;  %2491 = vmatprep.mubr.msk.f32.mxu1 %vm2671_vm1, %v2670_v2 }
 0x730   : > { %v1397_v36 = vpop.f32.mrf.mxu0 }
 0x731   : > { %2490 = vmatpush3.msra.mxu1 %v1397_v36 }
 0x732   : > { %v2483_v37 = vpop.f32.mrf.mxu0  ;;  %2501 = vmatprep.subr.mxu1 %v2670_v2 }
 0x7e9   : > { %v1473_v28 = vpop.f32.mrf.mxu1 }
 0x7ea   : > { %v1477_v29 = vsel %vm555_vm3, %v1473_v28, -inf }
 0x7eb   : > { %1478 = vmax.xlane.f32.xlu0 %v1477_v29  ;;  %v2488_v30 = vpop.f32.mrf.mxu1 }
 0x874   : > { %v1479_v31 = vpop.xlane.xlu0 %1478 }
 0x875   : > { %v1480_v32 = vsub.f32 %v1473_v28, %v1479_v31 }
 0x877   : > { %v1481_v33 = vmul.f32 1.442695, %v1480_v32 }
 0x879   : > { %2600 = vpow2.f32 %v1481_v33 }
 0x886   : > { %v2601_v34 = vpop.eup %2600 }
 0x887   : > { %v1483_v35 = vsel %vm555_vm3, %v2601_v34, 0.0 }
 0x888   : > { %1484 = vadd.xlane.f32.xlu1 %v1483_v35 }
 0x911   : > { %v1485_v40 = vpop.xlane.xlu1 %1484 }
 0x912   : > { %2602 = vrcp.f32 %v1485_v40 }
 0x91f   : > { %v2603_v41 = vpop.eup %2602 }
 0x920   : > { %v1487_v42 = vmul.f32 %v2603_v41, %v2601_v34 }
 0x922   : > { %2492 = vmatmul.mubr.msk.f32.vlgmr.msra.gmra.mxu1 %vm555_vm3, %v1487_v42 }
 0x923   : > { %2509 = vmatprep.mubr.msk.f32.mxu1 %vm2671_vm1, %v2670_v2  ;;  %2502 = vmatpush3.msra.mxu1 %v2240_v43 }
 0x924   : > { %2503 = vmatprep.subr.mxu1 %v2670_v2 }
 0x925   : > { %2504 = vmatpush3.msra.mxu1 %v2239_v44 }
 0x926   : > { %2505 = vmatprep.subr.mxu1 %v2670_v2 }
 0x927   : > { %2506 = vmatpush3.msra.mxu1 %v2238_v45 }
 0x928   : > { %2507 = vmatprep.subr.mxu1 %v2670_v2 }
 0x929   : > { %2508 = vmatpush3.msra.mxu1 %v2237_v46 }
 0x92a   : > { %2510 = vmatmul.mubr.msk.f32.vlgmr.msra.gmra.mxu1 %vm261_vm0, %v2796_v10  ;;  %2523 = vmatprep.subr.mxu1 %v2670_v2  ;;  %v2242_v10 = vld [vmem:[%s3140_s2 + $0x68] sm:$0xff] }
 0x92b   : > { %2531 = vmatprep.mubr.msk.f32.mxu1 %vm2671_vm1, %v2670_v2  ;;  %2524 = vmatpush3.msra.mxu1 %v2248_v60 }
 0x92c   : > { %2525 = vmatprep.subr.mxu1 %v2670_v2 }
 0x92d   : > { %2526 = vmatpush3.msra.mxu1 %v2247_v61 }
 0x92e   : > { %2527 = vmatprep.subr.mxu1 %v2670_v2 }
 0x92f   : > { %2528 = vmatpush3.msra.mxu1 %v2246_v62 }
 0x930   : > { %2529 = vmatprep.subr.mxu1 %v2670_v2 }
 0x931   : > { %2530 = vmatpush3.msra.mxu1 %v2245_v63 }
 0x932   : > { %2532 = vmatmul.mubr.msk.f32.vlgmr.msra.gmra.mxu1 %vm261_vm0, %v2791_v9  ;;  %2544 = vmatprep.subr.mxu1 %v2670_v2 }
 0x933   : > { %2548 = vmatprep.mubr.msk.f32.mxu1 %vm2671_vm1, %v2670_v2  ;;  %2545 = vmatpush3.msra.mxu1 %v2256_v12 }
 0x934   : > { %2546 = vmatprep.subr.mxu1 %v2670_v2 }
 0x935   : > { %2547 = vmatpush3.msra.mxu1 %v2255_v16 }
 0x9e2   : > { %v1557_v48 = vpop.f32.mrf.mxu1 }
 0x9e3   : > { %2499 = vmatmul.mubr.msk.f32.vlgmr.msra.gmra.mxu0 %vm478_vm2, %v1557_v48 }
 0x9e4   : > { %2513 = vmatpush3.msra.mxu0 %v2244_v47  ;;  %v2493_v50 = vpop.f32.mrf.mxu1  ;;  %2520 = vmatprep.mubr.msk.f32.mxu0 %vm2671_vm1, %v2670_v2 }
 0x9e5   : > { %2514 = vmatprep.subr.mxu0 %v2670_v2 }
 0x9e6   : > { %2515 = vmatpush3.msra.mxu0 %v2243_v49 }
 0x9e7   : > { %2516 = vmatprep.subr.mxu0 %v2670_v2 }
 0x9e8   : > { %2517 = vmatpush3.msra.mxu0 %v2242_v10 }
 0x9e9   : > { %2518 = vmatprep.subr.mxu0 %v2670_v2 }
 0x9ea   : > { %2519 = vmatpush3.msra.mxu0 %v2241_v51  ;;  %v1719_v52 = vpop.f32.mrf.mxu1 }
 0x9eb   : > { %2521 = vmatmul.mubr.msk.f32.vlgmr.msra.gmra.mxu0 %vm261_vm0, %v2791_v9  ;;  %2534 = vmatprep.subr.mxu0 %v2670_v2 }
 0x9ec   : > { %2536 = vmatprep.mubr.msk.f32.mxu0 %vm2671_vm1, %v2670_v2  ;;  %v2511_v53 = vpop.f32.mrf.mxu1 }
 0x9f2   : > { %v1859_v11 = vpop.f32.mrf.mxu1 }
 0x9f4   : > { %v2533_v9 = vpop.f32.mrf.mxu1 }
 0xaa3   : > { %v1633_v55 = vpop.f32.mrf.mxu0 }
 0xaa4   : > { %v1637_v56 = vadd.f32 %v1633_v55, %v1173_v54 }
 0xaa5   : > { %v2500_v57 = vpop.f32.mrf.mxu0 }
 0xaab   : > { %v1789_v58 = vpop.f32.mrf.mxu0 }
 0xaac   : > { %2535 = vmatpush3.xpose.msk.msra.mxu0 %vm478_vm2, %v1789_v58 }
 0xaad   : > { %v2522_v59 = vpop.f32.mrf.mxu0  ;;  %2539 = vmatprep.subr.mxu0 %v2670_v2 }
 0xaaf   : > { %2537 = vmatmul.mubr.msk.f32.vlgmr.msra.gmra.mxu0 %vm478_vm2, %v1719_v52 }
 0xab0   : > { %2541 = vmatprep.mubr.msk.f32.mxu0 %vm2671_vm1, %v2670_v2  ;;  %2540 = vmatpush3.msra.mxu0 %v1859_v11  ;;  %v2258_v2 = vld [vmem:[%s3143_s5] ss:$0 sm:$0xff] }
 0xb6f   : > { %v1935_v0 = vpop.f32.mrf.mxu0 }
 0xb70   : > { %v1939_v1 = vsel %vm555_vm3, %v1935_v0, -inf }
 0xb71   : > { %1940 = vmax.xlane.f32.xlu0 %v1939_v1  ;;  %v2538_v3 = vpop.f32.mrf.mxu0 }
 0xbfa   : > { %v1941_v4 = vpop.xlane.xlu0 %1940 }
 0xbfb   : > { %v1942_v5 = vsub.f32 %v1935_v0, %v1941_v4 }
 0xbfd   : > { %v1943_v6 = vmul.f32 1.442695, %v1942_v5 }
 0xbff   : > { %2604 = vpow2.f32 %v1943_v6 }
 0xc0c   : > { %v2605_v7 = vpop.eup %2604 }
 0xc0d   : > { %v1945_v8 = vsel %vm555_vm3, %v2605_v7, 0.0 }
 0xc0e   : > { %1946 = vadd.xlane.f32.xlu1 %v1945_v8 }
 0xc97   : > { %v1947_v13 = vpop.xlane.xlu1 %1946 }
 0xc98   : > { %2606 = vrcp.f32 %v1947_v13 }
 0xca5   : > { %v2607_v14 = vpop.eup %2606 }
 0xca6   : > { %v1949_v15 = vmul.f32 %v2607_v14, %v2605_v7 }
 0xca8   : > { %2542 = vmatmul.mubr.msk.f32.vlgmr.msra.gmra.mxu0 %vm555_vm3, %v1949_v15 }
 0xd68   : > { %v2019_v17 = vpop.f32.mrf.mxu0 }
 0xd69   : > { %2549 = vmatmul.mubr.msk.f32.vlgmr.msra.gmra.mxu1 %vm478_vm2, %v2019_v17 }
 0xd6a   : > { %v2543_v18 = vpop.f32.mrf.mxu0 }
 0xe29   : > { %v2095_v19 = vpop.f32.mrf.mxu1 }
 0xe2a   : > { %v2099_v20 = vadd.f32 %v2095_v19, %v1637_v56 }
 0xe2b   : > { %v2550_v21 = vpop.f32.mrf.mxu1 }
 0xe2c   : > { %v2107_v22 = vadd.f32 %v2258_v2, %v2099_v20 }
 0xe2e   : > { %2108 = vst.msk [vmem:[%s242_s11] sm:$0xff] %vm261_vm0, %v2107_v22 }
 0xe2f   : > { %2621 = shalt.err (!%p2618_p3)
}
 0xe30   : > { %s2622_s20 = scalar_lea.hbm %s2121_s15, 128  ;;  %s2626_s29 = scalar_lea.hbm %s3144_s6, 256 }
 0xe31   : > { %p2623_p4 = scmp.ne.s32.totalorder %s2121_s15, %s2622_s20  ;;  %p2627_p9 = scmp.lt.s32.totalorder %s2121_s15, %s3144_s6 }
 0xe32   : > { %p2628_p10 = scmp.lt.s32.totalorder %s2626_s29, %s2622_s20 }
 0xe33   : > { %p2624_p7 = pnand %p2623_p4, %p2746_p5 }
 0xe34   : > { %p2629_p11 = por %p2628_p10, %p2627_p9 }
 0xe35   : > { %p2625_p8 = pneg %p2624_p7 }
 0xe37   : > { %p2630_p12 = pnand %p2629_p11, %p2625_p8 }
 0xe39   : > { %2633 = shalt.err (!%p2630_p12)
}
 0xe3a   : > { %2551 = dma.vmem_to_hbm [thread:$0]  (%p2746_p5), %s2124_s12, 128, %s2121_s15, %s2110_s16  }
 0xe3b PF: > { %p2557_p13 = scmp.ge.s32.totalorder %s2668_s24, 2  ;;  %s2135_s11 = sand.u32 1, %s2656_s21  }
 0xe3c   : > { %s2136_s13 = scalar_lea.sflag [#allocation3], %s2135_s11 }
 0xe3d   : > { %p2554_p0 = pnand %p2557_p13, %p2750_p6 }
 0xe3f   : > { %p2555_p1 = pneg %p2554_p0 }
 0xe41   : > { %2651 = dma.done.wait (%p2555_p1), %s2136_s13, 128  }
 0xe42   : > { %2653 = vsyncadd (%p2555_p1), %s2136_s13, 4294967168  ;;  %p16_p2 = scmp.ge.s32.totalorder %s2733_s27, 4   ;;  %s3147_s21 = smov %s2660_s22 }
 0xe43   : > { %s3148_s22 = smov %s2664_s23  ;;  %s3149_s23 = smov %s2744_s30 }
 0xe44   : > { %s3150_s24 = smov %s2733_s27  ;;  %18 = sbr.rel (!%p16_p2) target bundleno = 3 (0x3), region = 91 }
 0xe49   :  { %2141 = vsyncpa [#allocation3], 1 }
 0xe4a   :  { %2143 = vsyncpa [#allocation3 + $0x1], 1 }

</bundles_post_ra>
